<compile_context>
chip_gen: v7x
topology: tpu7x:2x2x1
jax: 0.10.0
libtpu: 0.0.40
codegen_flags: <defaults>
</compile_context>

<pallas_src>
import functools

import jax
import jax.numpy as jnp
from jax.experimental import pallas as pl
from jax.experimental.pallas import tpu as pltpu


def _round_down(x: int, m: int) -> int:
    return (x // m) * m


def _weighted_l2_mean_kernel(w_ref, pred_ref, targ_ref, out_ref, acc_ref, *,
                             total_rows, tile_rows, tiles_per_core,
                             slab, n_slabs, need_row_mask, unroll):
    """Grid step (c, i): accumulate per-lane sum of (pred-targ)^2 for one row tile.

    acc_ref : (slab, F) f32 VMEM accumulator carried across the inner
              ("arbitrary") grid axis (per-core under megacore).
    out_ref : (1, 8, 128) per-core partial; written (full block, lane-dense)
              only in the finalize step, with weights + one cross-lane reduce.
    """
    c = pl.program_id(0)
    i = pl.program_id(1)

    @pl.when(i == 0)
    def _init():
        acc_ref[...] = jnp.zeros_like(acc_ref)

    # Logical (unclamped) tile index -> global starting row (only used for the mask).
    row0 = (c * tiles_per_core + i) * tile_rows

    def accumulate(s):
        start = s * slab
        if not isinstance(start, int):
            start = pl.multiple_of(start, slab)
        # Narrow (e.g. bf16) DMA'd data is cast in-register; everything stays
        # chunk-sized so no (TR, F) intermediates spill to VMEM.
        p = pred_ref[pl.ds(start, slab), :].astype(jnp.float32)
        t = targ_ref[pl.ds(start, slab), :].astype(jnp.float32)
        d = p - t
        sq = d * d
        if need_row_mask:
            # Rows past `total_rows` (partial last tile or clamped duplicate
            # tiles) may hold garbage/NaN -> zero the squared term directly.
            rows = row0 + start + jax.lax.broadcasted_iota(jnp.int32, (slab, 1), 0)
            sq = jnp.where(rows < total_rows, sq, 0.0)
        acc_ref[...] += sq

    if n_slabs <= unroll:
        for s in range(n_slabs):
            accumulate(s)
    else:
        n_blocks = n_slabs // unroll

        def body(blk, carry):
            base = blk * unroll
            for u in range(unroll):
                accumulate(base + u)
            return carry

        jax.lax.fori_loop(0, n_blocks, body, 0)
        for s in range(n_blocks * unroll, n_slabs):
            accumulate(s)

    @pl.when(i == tiles_per_core - 1)
    def _finalize():
        # Weight multiply + single cross-lane reduce happen once per core.
        w = w_ref[...].astype(jnp.float32)            # (1, F)
        partial = jnp.sum(acc_ref[...] * w)
        out_ref[...] = jnp.full(out_ref.shape, partial, jnp.float32)


def weighted_state_loss(pred, targ, weights, *, max_tile_rows=2048,
                        min_pallas_elements=0):
    """Pallas equivalent of WeightedStateLoss.forward with _loss = L2 ('none').

        pred, targ : [batch_size, horizon, transition_dim]
        weights    : broadcastable to [horizon, transition_dim]

    Returns (weighted_loss, {'a0_loss': weighted_loss}).
    """
    # TODO(synk): the spec's `self._loss` is abstract; concretized as L2 (squared
    # error, reduction='none'), matching diffuser's WeightedStateL2 subclass.
    assert pred.shape == targ.shape and pred.ndim == 3
    assert pred.dtype == targ.dtype
    B, H, T = pred.shape
    F = H * T
    N = B * F
    itemsize = pred.dtype.itemsize

    w_full = jnp.broadcast_to(jnp.asarray(weights, jnp.float32), (H, T))

    def _xla_fallback():
        d = pred.astype(jnp.float32) - targ.astype(jnp.float32)
        loss = jnp.mean(d * d * w_full[None])
        return loss, {"a0_loss": loss}

    if N < min_pallas_elements:
        return _xla_fallback()

    # Lane-dense 2-D view; no padding (ragged tails handled in-kernel).
    pred2 = pred.reshape(B, F)
    targ2 = targ.reshape(B, F)
    w2 = w_full.reshape(1, F)

    # ---- row tiling ---------------------------------------------------------
    if B < 16:
        TR = B                      # full-extent row block (always legal)
        slab = B
    else:
        # ~4 MiB per input per pipeline buffer: 2 inputs x 2 buffers ~= 16 MiB,
        # large enough to hide per-step overhead, safely under v7x's 64 MiB VMEM.
        per_buf_budget = 4 * 1024 * 1024
        rows_by_vmem = max(16, _round_down(per_buf_budget // max(1, F * itemsize), 16))
        TR = max(16, min(rows_by_vmem, _round_down(B, 16),
                         _round_down(max(16, max_tile_rows), 16)))
        slab = 16
    n_slabs = TR // slab

    n_row_tiles = -(-B // TR)
    NC = 2 if n_row_tiles >= 2 else 1           # split row tiles across v7x's 2 TCs
    tiles_per_core = -(-n_row_tiles // NC)
    need_row_mask = (NC * tiles_per_core * TR != B)

    # Explicit scoped-VMEM budget (v5e's default is only 16 MiB).
    vmem_need = (2 * 2 * TR * F * itemsize      # pred + targ, double-buffered
                 + 2 * F * 4                    # weights
                 + slab * F * 4                 # accumulator scratch
                 + 4 * slab * F * 4             # slab-sized elementwise temporaries
                 + 2 * 8 * 128 * 4)             # output block
    if vmem_need > 48 * 1024 * 1024:
        # TODO(synk): horizon*transition_dim too large for a single row-strip
        # kernel (would need lane tiling); fall back to fused XLA.
        return _xla_fallback()
    vmem_limit = int(min(56 * 1024 * 1024,
                         max(32 * 1024 * 1024, vmem_need + (8 << 20))))

    last_tile = n_row_tiles - 1

    def row_map(c, i):
        # Clamp fully-out-of-range tiles (odd tile counts under the 2-core split)
        # to the last valid tile; the in-kernel row mask zeroes their contribution.
        return (jnp.minimum(c * tiles_per_core + i, last_tile), 0)

    kernel = functools.partial(
        _weighted_l2_mean_kernel,
        total_rows=B, tile_rows=TR, tiles_per_core=tiles_per_core,
        slab=slab, n_slabs=n_slabs, need_row_mask=need_row_mask, unroll=8)

    out = pl.pallas_call(
        kernel,
        out_shape=jax.ShapeDtypeStruct((NC, 8, 128), jnp.float32),
        grid=(NC, tiles_per_core),
        in_specs=[
            pl.BlockSpec((1, F), lambda c, i: (0, 0)),      # weights (resident)
            pl.BlockSpec((TR, F), row_map),                 # pred row tile
            pl.BlockSpec((TR, F), row_map),                 # targ row tile
        ],
        out_specs=pl.BlockSpec((1, 8, 128), lambda c, i: (c, 0, 0)),
        scratch_shapes=[pltpu.VMEM((slab, F), jnp.float32)],
        compiler_params=pltpu.CompilerParams(
            dimension_semantics=("parallel", "arbitrary"),
            vmem_limit_bytes=vmem_limit),
        cost_estimate=pl.CostEstimate(
            flops=3 * N + 2 * F,
            transcendentals=0,
            bytes_accessed=(2 * NC * tiles_per_core * TR * F * itemsize
                            + F * 4 + NC * 8 * 128 * 4)),
    )(w2, pred2, targ2)

    loss = jnp.sum(out[:, 0, 0]) * (1.0 / float(N))
    return loss, {"a0_loss": loss}


if __name__ == "__main__":
    key = jax.random.PRNGKey(0)
    keys = jax.random.split(key, 9)

    # --- Test 1: small shape, f32, single tile (B < 16 path) -----------------
    B, H, T = 4, 8, 16
    pred = jax.random.normal(keys[0], (B, H, T), dtype=jnp.float32)
    targ = jax.random.normal(keys[1], (B, H, T), dtype=jnp.float32)
    weights = jax.random.uniform(keys[2], (H, T), dtype=jnp.float32)

    loss_val, info = weighted_state_loss(pred, targ, weights)
    jax.block_until_ready(loss_val)
    ref = jnp.mean((pred - targ) ** 2 * weights[None])
    assert jnp.allclose(loss_val, ref, rtol=1e-5, atol=1e-6), (loss_val, ref)
    assert jnp.allclose(info["a0_loss"], ref, rtol=1e-5, atol=1e-6)

    # --- Test 2: bf16 inputs, ragged rows/lanes, 2-core split + row mask -----
    B2, H2, T2 = 40, 12, 11
    pred_b = jax.random.normal(keys[3], (B2, H2, T2), dtype=jnp.float32).astype(jnp.bfloat16)
    targ_b = jax.random.normal(keys[4], (B2, H2, T2), dtype=jnp.float32).astype(jnp.bfloat16)
    weights_b = jax.random.uniform(keys[5], (H2, T2), dtype=jnp.float32)

    loss_b, info_b = weighted_state_loss(pred_b, targ_b, weights_b, max_tile_rows=16)
    jax.block_until_ready(loss_b)
    d_ref = pred_b.astype(jnp.float32) - targ_b.astype(jnp.float32)
    ref_b = jnp.mean(d_ref * d_ref * weights_b[None])
    assert jnp.allclose(loss_b, ref_b, rtol=1e-4, atol=1e-5), (loss_b, ref_b)
    assert jnp.allclose(info_b["a0_loss"], ref_b, rtol=1e-4, atol=1e-5)

    # --- Test 3: larger batch, fori_loop slab path + partial last tile -------
    B3, H3, T3 = 200, 2, 16
    pred_c = jax.random.normal(keys[6], (B3, H3, T3), dtype=jnp.float32)
    targ_c = jax.random.normal(keys[7], (B3, H3, T3), dtype=jnp.float32)
    weights_c = jax.random.uniform(keys[8], (H3, T3), dtype=jnp.float32)

    loss_c, _ = weighted_state_loss(pred_c, targ_c, weights_c)
    jax.block_until_ready(loss_c)
    ref_c = jnp.mean((pred_c - targ_c) ** 2 * weights_c[None])
    assert jnp.allclose(loss_c, ref_c, rtol=1e-5, atol=1e-6), (loss_c, ref_c)

    print("KERNEL_OK")
</pallas_src>

<mosaic_0001>
module attributes {stable_mosaic.version = 11 : i64} {
  func.func @_weighted_l2_mean_kernel(%arg0: i32, %arg1: i32, %arg2: memref<1x128xf32, #tpu.memory_space<vmem>>, %arg3: memref<4x128xf32, #tpu.memory_space<vmem>>, %arg4: memref<4x128xf32, #tpu.memory_space<vmem>>, %arg5: memref<1x8x128xf32, #tpu.memory_space<vmem>>, %arg6: memref<4x128xf32, #tpu.memory_space<vmem>>) attributes {dimension_semantics = [#tpu.dimension_semantics<parallel>, #tpu.dimension_semantics<arbitrary>], iteration_bounds = array<i64: 1, 1>, scalar_prefetch = 0 : i64, scratch_operands = 1 : i64, tpu.core_type = #tpu.core_type<tc>, window_params = [{pipeline_mode = #tpu.pipeline_mode<synchronous>, transform_indices = @transform_0, window_bounds = array<i64: 1, 128>}, {transform_indices = @transform_1, window_bounds = array<i64: 4, 128>}, {transform_indices = @transform_2, window_bounds = array<i64: 4, 128>}, {transform_indices = @transform_3, window_bounds = array<i64: 1, 8, 128>}]} {
    %c0_i32 = arith.constant 0 : i32
    %0 = arith.cmpi eq, %arg1, %c0_i32 : i32
    %1 = arith.extui %0 : i1 to i32
    %c0_i32_0 = arith.constant 0 : i32
    %2 = arith.cmpi ne, %1, %c0_i32_0 : i32
    scf.if %2 {
      %cst = arith.constant 0.000000e+00 : f32
      %13 = vector.broadcast %cst : f32 to vector<4x128xf32>
      %c0_10 = arith.constant 0 : index
      %c0_11 = arith.constant 0 : index
      %14 = vector.load %arg6[%c0_10, %c0_11] : memref<4x128xf32, #tpu.memory_space<vmem>>, vector<4x128xf32>
      tpu.vector_store %arg6[%c0_10, %c0_11], %13 {strides = array<i32>} : memref<4x128xf32, #tpu.memory_space<vmem>>, vector<4x128xf32>,
    } else {
    }
    %c0 = arith.constant 0 : index
    %c0_1 = arith.constant 0 : index
    %3 = vector.load %arg3[%c0, %c0_1] : memref<4x128xf32, #tpu.memory_space<vmem>>, vector<4x128xf32>
    %c0_2 = arith.constant 0 : index
    %c0_3 = arith.constant 0 : index
    %4 = vector.load %arg4[%c0_2, %c0_3] : memref<4x128xf32, #tpu.memory_space<vmem>>, vector<4x128xf32>
    %5 = arith.subf %3, %4 : vector<4x128xf32>
    %6 = arith.mulf %5, %5 : vector<4x128xf32>
    %c0_4 = arith.constant 0 : index
    %c0_5 = arith.constant 0 : index
    %7 = vector.load %arg6[%c0_4, %c0_5] : memref<4x128xf32, #tpu.memory_space<vmem>>, vector<4x128xf32>
    %8 = arith.addf %7, %6 : vector<4x128xf32>
    %c0_6 = arith.constant 0 : index
    %c0_7 = arith.constant 0 : index
    %9 = vector.load %arg6[%c0_6, %c0_7] : memref<4x128xf32, #tpu.memory_space<vmem>>, vector<4x128xf32>
    tpu.vector_store %arg6[%c0_6, %c0_7], %8 {strides = array<i32>} : memref<4x128xf32, #tpu.memory_space<vmem>>, vector<4x128xf32>,
    %c0_i32_8 = arith.constant 0 : i32
    %10 = arith.cmpi eq, %arg1, %c0_i32_8 : i32
    %11 = arith.extui %10 : i1 to i32
    %c0_i32_9 = arith.constant 0 : i32
    %12 = arith.cmpi ne, %11, %c0_i32_9 : i32
    scf.if %12 {
      %c0_10 = arith.constant 0 : index
      %c0_11 = arith.constant 0 : index
      %13 = vector.load %arg2[%c0_10, %c0_11] : memref<1x128xf32, #tpu.memory_space<vmem>>, vector<1x128xf32>
      %c0_12 = arith.constant 0 : index
      %c0_13 = arith.constant 0 : index
      %14 = vector.load %arg6[%c0_12, %c0_13] : memref<4x128xf32, #tpu.memory_space<vmem>>, vector<4x128xf32>
      %15 = vector.broadcast %13 : vector<1x128xf32> to vector<4x128xf32>
      %16 = arith.mulf %14, %15 : vector<4x128xf32>
      %17 = vector.shape_cast %16 : vector<4x128xf32> to vector<1x4x128xf32>
      %cst = arith.constant dense<0.000000e+00> : vector<1xf32>
      %18 = vector.multi_reduction <add>, %17, %cst [1, 2] : vector<1x4x128xf32> to vector<1xf32>
      %19 = vector.shape_cast %18 : vector<1xf32> to vector<1x1x1xf32>
      %20 = vector.extract %19[0, 0, 0] : f32 from vector<1x1x1xf32>
      %21 = vector.broadcast %20 : f32 to vector<1x8x128xf32>
      %c0_14 = arith.constant 0 : index
      %c0_15 = arith.constant 0 : index
      %c0_16 = arith.constant 0 : index
      %22 = vector.load %arg5[%c0_14, %c0_15, %c0_16] : memref<1x8x128xf32, #tpu.memory_space<vmem>>, vector<1x8x128xf32>
      tpu.vector_store %arg5[%c0_14, %c0_15, %c0_16], %21 {strides = array<i32>} : memref<1x8x128xf32, #tpu.memory_space<vmem>>, vector<1x8x128xf32>,
    } else {
    }
    return
  }
  func.func @transform_0(%arg0: i32, %arg1: i32) -> (i32, i32) {
    %c0_i32 = arith.constant 0 : i32
    %c0_i32_0 = arith.constant 0 : i32
    %c0_i32_1 = arith.constant 0 : i32
    return %c0_i32, %c0_i32_0 : i32, i32
  }
  func.func @transform_1(%arg0: i32, %arg1: i32) -> (i32, i32) {
    %c1_i32 = arith.constant 1 : i32
    %0 = arith.muli %arg0, %c1_i32 : i32
    %1 = arith.addi %0, %arg1 : i32
    %c0_i32 = arith.constant 0 : i32
    %2 = arith.minsi %1, %c0_i32 : i32
    %c0_i32_0 = arith.constant 0 : i32
    %c0_i32_1 = arith.constant 0 : i32
    return %2, %c0_i32_0 : i32, i32
  }
  func.func @transform_2(%arg0: i32, %arg1: i32) -> (i32, i32) {
    %c1_i32 = arith.constant 1 : i32
    %0 = arith.muli %arg0, %c1_i32 : i32
    %1 = arith.addi %0, %arg1 : i32
    %c0_i32 = arith.constant 0 : i32
    %2 = arith.minsi %1, %c0_i32 : i32
    %c0_i32_0 = arith.constant 0 : i32
    %c0_i32_1 = arith.constant 0 : i32
    return %2, %c0_i32_0 : i32, i32
  }
  func.func @transform_3(%arg0: i32, %arg1: i32) -> (i32, i32, i32) {
    %c0_i32 = arith.constant 0 : i32
    %c0_i32_0 = arith.constant 0 : i32
    %c0_i32_1 = arith.constant 0 : i32
    return %arg0, %c0_i32, %c0_i32_0 : i32, i32, i32
  }
}

</mosaic_0001>

<bundles_post_ra>
// kernel: tpu_custom_call.1
= control target key start
LH: loop header
LB: loop body
LE: loop exit
PB: predicated region body
PF: predicated region fallthrough
CT: control target
= control target key end

     0   :  { %8 = vsyncpa [#allocation4], 0  ;;  %s277_s0 = inlined_call_operand.hbm [shape: f32[1,128], index: 0, kind: input, shape index: {}]   ;;  %s278_s1 = inlined_call_operand.hbm [shape: f32[4,128], index: 1, kind: input, shape index: {}]   ;;  %s279_s2 = inlined_call_operand.vmem [shape: f32[4,128], index: 2, kind: input, shape index: {}]   ;;  %s280_s3 = inlined_call_operand.hbm [shape: f32[1,8,128], index: 3, kind: output, shape index: {}]  }
   0x1   :  { %9 = vsyncpa [#allocation7], 0 }
   0x2   :  { %10 = vsyncpa [#allocation5], 0  ;;  %s214_s12 = smov [#allocation3]   ;;  %s215_s14 = smov [#allocation6]  }
   0x3   :  { %s17_s13 = sshll.u32 %s214_s12, 4  ;;  %s32_s15 = sshll.u32 %s215_s14, 4  ;;  %s18_s13 = int_to_ptr.vmem [resolvable:$true] %s17_s13  ;;  %s33_s15 = int_to_ptr.vmem [resolvable:$true] %s32_s15 }
   0x4   :  { %s142_s18 = scalar_lea.hbm %s277_s0, 16 }
   0x5   :  { %p143_p0 = scmp.ne.s32.totalorder %s277_s0, %s142_s18  ;;  %p146_p1 = scmp.lt.u32.totalorder %s142_s18, %s277_s0 }
   0x7   :  { %p148_p2 = pnand %p146_p1, %p143_p0 }
   0x9   :  { %151 = shalt.err (!%p148_p2)
}
   0xa   :  { %s152_s23 = scalar_lea.vmem %s18_s13, 16  ;;  %s156_s24 = scalar_lea.vmem %s18_s13, 32 }
   0xb   :  { %p153_p3 = scmp.ne.s32.totalorder %s18_s13, %s152_s23  ;;  %p157_p4 = scmp.lt.s32.totalorder %s18_s13, %s18_s13 }
   0xc   :  { %p158_p5 = scmp.lt.s32.totalorder %s156_s24, %s152_s23 }
   0xe   :  { %p159_p6 = por %p158_p5, %p157_p4 }
  0x10   :  { %p160_p7 = pnand %p159_p6, %p153_p3 }
  0x12   :  { %163 = shalt.err (!%p160_p7)
}
  0x13   :  { %20 = dma.hbm_to_vmem [thread:$0]  %s277_s0, 16, %s18_s13, [#allocation4]  }
  0x14   :  { %s164_s29 = scalar_lea.hbm %s278_s1, 64 }
  0x15   :  { %p165_p8 = scmp.ne.s32.totalorder %s278_s1, %s164_s29  ;;  %p168_p9 = scmp.lt.u32.totalorder %s164_s29, %s278_s1 }
  0x17   :  { %p170_p10 = pnand %p168_p9, %p165_p8 }
  0x19   :  { %173 = shalt.err (!%p170_p10)
}
  0x1a   :  { %s174_s7 = scalar_lea.vmem %s33_s15, 64  ;;  %p179_p12 = scmp.lt.s32.totalorder %s33_s15, %s33_s15 }
  0x1b   :  { %p175_p11 = scmp.ne.s32.totalorder %s33_s15, %s174_s7  ;;  %p180_p13 = scmp.lt.s32.totalorder %s174_s7, %s174_s7 }
  0x1d   :  { %p181_p0 = por %p180_p13, %p179_p12 }
  0x1f   :  { %p182_p1 = pnand %p181_p0, %p175_p11 }
  0x21   :  { %185 = shalt.err (!%p182_p1)
}
  0x22   :  { %35 = dma.hbm_to_vmem [thread:$0]  %s278_s1, 64, %s33_s15, [#allocation7]  }
  0x23   :  { %208 = dma.done.wait [#allocation4], 16  }
  0x24   :  { %209 = vsyncadd [#allocation4], 4294967280 }
  0x25   :  { %210 = dma.done.wait [#allocation7], 64  }
  0x26   :  { %211 = vsyncadd [#allocation7], 4294967232  ;;  %v216_v0 = vmov 0.0   ;;  %v79_v1 = vld [vmem:[#allocation6] sm:$0xf]  ;;  %vm98_vm0 = vcmask 1043456  }
  0x27   :  { %78 = vst [vmem:[#allocation2] sm:$0xf] %v216_v0  ;;  %v80_v2 = vld [vmem:[%s279_s2] sm:$0xf]  ;;  %v135_v7 = vld [vmem:[#allocation3] ss:$0 sm:$0xff] }
  0x28   :  { %v81_v3 = vsub.f32 %v79_v1, %v80_v2  ;;  %s217_s1 = smov [#allocation8]  }
  0x29   :  { %s117_s2 = sshll.u32 %s217_s1, 4  ;;  %s118_s2 = int_to_ptr.vmem [resolvable:$true] %s117_s2 }
  0x2a   :  { %v82_v5 = vmul.f32 %v81_v3, %v81_v3  ;;  %s186_s12 = scalar_lea.vmem %s118_s2, 128  ;;  %p191_p3 = scmp.lt.s32.totalorder %s118_s2, %s118_s2 }
  0x2b   :  { %p187_p2 = scmp.ne.s32.totalorder %s118_s2, %s186_s12  ;;  %p192_p4 = scmp.lt.s32.totalorder %s186_s12, %s186_s12 }
  0x2d   :  { %p193_p5 = por %p192_p4, %p191_p3 }
  0x2e   :  { %v83_v4 = vld [vmem:[#allocation2] sm:$0xf] }
  0x2f   :  { %v84_v6 = vadd.f32 %v83_v4, %v82_v5  ;;  %p194_p6 = pnand %p193_p5, %p187_p2 }
  0x31   :  { %85 = vst [vmem:[#allocation2] sm:$0xf] %v84_v6 }
  0x38   :  { %v90_v8 = vld [vmem:[#allocation2] sm:$0xf] }
  0x39   :  { %v97_v9 = vmul.f32 %v135_v7, %v90_v8 }
  0x3b   :  { %v99_v10 = vsel %vm98_vm0, %v97_v9, 0.0 }
  0x3c   :  { %100 = vadd.xlane.f32.xlu0 %v99_v10 }
  0xc9   :  { %v101_v11 = vpop.xlane.xlu0 %100 }
  0xca   :  { %v102_v12 = vrot.slane %v101_v11, 4 }
  0xcc   :  { %v103_v13 = vadd.f32 %v102_v12, %v101_v11 }
  0xce   :  { %v104_v14 = vrot.slane %v103_v13, 2 }
  0xd0   :  { %v105_v15 = vadd.f32 %v104_v14, %v103_v13 }
  0xd2   :  { %v106_v16 = vrot.slane %v105_v15, 1 }
  0xd4   :  { %v107_v17 = vadd.f32 %v106_v16, %v105_v15 }
  0xd6   :  { %136 = vpush %v107_v17 }
 0x107   :  { %s137_s11 = spop %136 }
 0x108   :  { %v109_v18 = vstv %s137_s11 }
 0x109   :  { %110 = vst [vmem:[#allocation8] sm:$0xff] %v109_v18 }
 0x10a   :  { %197 = shalt.err (!%p194_p6)
}
 0x10b   :  { %s198_s15 = scalar_lea.hbm %s280_s3, 128 }
 0x10c   :  { %p199_p7 = scmp.ne.s32.totalorder %s280_s3, %s198_s15  ;;  %p202_p8 = scmp.lt.u32.totalorder %s198_s15, %s280_s3 }
 0x10e   :  { %p204_p9 = pnand %p202_p8, %p199_p7 }
 0x110   :  { %207 = shalt.err (!%p204_p9)
}
 0x111   :  { %120 = dma.vmem_to_hbm [thread:$0]  %s118_s2, 128, %s280_s3, [#allocation5]  }
 0x112   :  { %212 = dma.done.wait [#allocation5], 128  }
 0x113   :  { %213 = vsyncadd [#allocation5], 4294967168 }
 0x114   :  { %124 = vsyncpa [#allocation4], 1 }
 0x115   :  { %125 = vsyncpa [#allocation7], 1 }
 0x116   :  { %126 = vsyncpa [#allocation5], 1 }

</bundles_post_ra>
